<compile_context>
chip_gen: v7x
topology: tpu7x:2x2x1
jax: 0.10.0
libtpu: 0.0.40
codegen_flags: <defaults>
</compile_context>

<pallas_src>
import jax
import jax.numpy as jnp
from jax.experimental import pallas as pl
from jax.experimental.pallas import tpu as pltpu


def mlp_kernel(x_ref, w1_ref, b1_ref, w2_ref, b2_ref, w3_ref, b3_ref, o_ref):
    # Layer 1: Linear + Tanh (bf16 MXU inputs, f32 accumulation, f32 tanh).
    x = x_ref[...].astype(jnp.bfloat16)
    h1 = jnp.dot(x, w1_ref[...], preferred_element_type=jnp.float32)
    h1 = jnp.tanh(h1 + b1_ref[...])
    # Layer 2: Linear + Tanh.
    h2 = jnp.dot(h1.astype(jnp.bfloat16), w2_ref[...],
                 preferred_element_type=jnp.float32)
    h2 = jnp.tanh(h2 + b2_ref[...])
    # Output layer: Linear (no activation).
    out = jnp.dot(h2.astype(jnp.bfloat16), w3_ref[...],
                  preferred_element_type=jnp.float32)
    o_ref[...] = (out + b3_ref[...]).astype(o_ref.dtype)


def _round_up(n, m):
    return ((n + m - 1) // m) * m


def _pad2(a, rows, cols):
    """Zero-pad a 2-D array to (rows, cols)."""
    return jnp.pad(a, ((0, rows - a.shape[0]), (0, cols - a.shape[1])))


def prepare_params(w1, b1, w2, b2, w3, b3):
    """One-time param prep (do this once, not per forward call):
      * pad hidden dims N1, N2 to multiples of 128 lanes (zero pad is inert),
      * cast weights to bf16 for the MXU; biases stay f32 for the f32 epilogue.
    The input dim K and the class dim C are left at their true sizes so the
    streamed x tiles and the output stores carry no padded HBM bytes.
    """
    K, N1 = w1.shape
    N2 = w2.shape[1]
    C = w3.shape[1]
    N1p = _round_up(N1, 128)
    N2p = _round_up(N2, 128)

    w1p = _pad2(w1, K, N1p).astype(jnp.bfloat16)
    b1p = _pad2(b1, 1, N1p).astype(jnp.float32)
    w2p = _pad2(w2, N1p, N2p).astype(jnp.bfloat16)
    b2p = _pad2(b2, 1, N2p).astype(jnp.float32)
    w3p = _pad2(w3, N2p, C).astype(jnp.bfloat16)
    b3p = _pad2(b3, 1, C).astype(jnp.float32)
    return w1p, b1p, w2p, b2p, w3p, b3p


def mlp_forward(x, params, *, batch_tile=1024):
    """x: [B, input_dim] -> [B, num_classes]. `params` from prepare_params."""
    w1p, b1p, w2p, b2p, w3p, b3p = params
    B, K = x.shape
    N1p = w1p.shape[1]
    N2p = w2p.shape[1]
    C = w3p.shape[1]
    assert w1p.shape[0] == K, "input_dim mismatch between x and weights"

    # Batch tiling: large tiles amortize the ~0.35us/step overhead, but keep
    # at least 2 grid steps whenever possible so the "parallel" axis shards
    # across v7x's two TensorCores.  TB is derived from B (multiple of 8
    # sublanes) so last-tile padding waste is < 8 rows per tile.
    n_tiles = pl.cdiv(B, batch_tile)
    if B > 8:
        n_tiles = max(n_tiles, 2)
    TB = _round_up(pl.cdiv(B, n_tiles), 8)
    grid_b = pl.cdiv(B, TB)
    Bp = grid_b * TB

    xb = x if Bp == B else jnp.pad(x, ((0, Bp - B), (0, 0)))

    # Cost estimate from the shapes the kernel actually processes.
    cost = pl.CostEstimate(
        flops=2 * Bp * (K * N1p + N1p * N2p + N2p * C),
        transcendentals=Bp * (N1p + N2p),
        bytes_accessed=(
            x.dtype.itemsize * Bp * K            # streamed input
            + 2 * (w1p.size + w2p.size + w3p.size)  # bf16 weights
            + 4 * (b1p.size + b2p.size + b3p.size)  # f32 biases
            + x.dtype.itemsize * Bp * C          # output
        ),
    )

    out = pl.pallas_call(
        mlp_kernel,
        out_shape=jax.ShapeDtypeStruct((Bp, C), x.dtype),
        grid=(grid_b,),
        in_specs=[
            # Streamed batch tile; last dim = full array dim (no lane pad).
            pl.BlockSpec((TB, K), lambda i: (i, 0)),
            # Weights / biases: VMEM-resident, same block every grid step.
            pl.BlockSpec((K, N1p), lambda i: (0, 0)),
            pl.BlockSpec((1, N1p), lambda i: (0, 0)),
            pl.BlockSpec((N1p, N2p), lambda i: (0, 0)),
            pl.BlockSpec((1, N2p), lambda i: (0, 0)),
            pl.BlockSpec((N2p, C), lambda i: (0, 0)),
            pl.BlockSpec((1, C), lambda i: (0, 0)),
        ],
        # Unpadded class dim: last dim = full array dim.
        out_specs=pl.BlockSpec((TB, C), lambda i: (i, 0)),
        compiler_params=pltpu.CompilerParams(
            dimension_semantics=("parallel",),
        ),
        cost_estimate=cost,
    )(xb, w1p, b1p, w2p, b2p, w3p, b3p)

    return out if Bp == B else out[:B]


def init_params(key, input_dim, num_nodes_h1, num_nodes_h2, num_classes):
    """Deterministic init mimicking nn.Linear's uniform(-1/sqrt(fan_in), ...).
    Weights stored as [in_dim, out_dim] (transposed vs. PyTorch)."""
    def linear_init(k, fan_in, fan_out):
        kw, kb = jax.random.split(k)
        bound = 1.0 / jnp.sqrt(fan_in)
        w = jax.random.uniform(kw, (fan_in, fan_out), jnp.float32, -bound, bound)
        b = jax.random.uniform(kb, (1, fan_out), jnp.float32, -bound, bound)
        return w, b

    k1, k2, k3 = jax.random.split(key, 3)
    w1, b1 = linear_init(k1, input_dim, num_nodes_h1)
    w2, b2 = linear_init(k2, num_nodes_h1, num_nodes_h2)
    w3, b3 = linear_init(k3, num_nodes_h2, num_classes)
    return w1, b1, w2, b2, w3, b3


if __name__ == "__main__":
    # Small shapes consistent with the module's forward.
    batch = 8
    input_dim = 32
    num_nodes_h1 = 64
    num_nodes_h2 = 32
    num_classes = 16

    key = jax.random.PRNGKey(0)
    kx, kp = jax.random.split(key)

    x = jax.random.normal(kx, (batch, input_dim), dtype=jnp.float32)
    w1, b1, w2, b2, w3, b3 = init_params(
        kp, input_dim, num_nodes_h1, num_nodes_h2, num_classes)

    # One-time parameter prep (padding + bf16 cast), hoisted out of forward.
    params = prepare_params(w1, b1, w2, b2, w3, b3)

    out = mlp_forward(x, params)
    out = jax.block_until_ready(out)
    assert out.shape == (batch, num_classes)

    bf16 = jnp.bfloat16
    # Reference with the same bf16-input / f32-accumulate precision choice:
    # the kernel should match this very tightly.
    h1 = jnp.tanh(jnp.dot(x.astype(bf16), w1.astype(bf16),
                          preferred_element_type=jnp.float32) + b1)
    h2 = jnp.tanh(jnp.dot(h1.astype(bf16), w2.astype(bf16),
                          preferred_element_type=jnp.float32) + b2)
    ref_bf16 = jnp.dot(h2.astype(bf16), w3.astype(bf16),
                       preferred_element_type=jnp.float32) + b3
    assert jnp.allclose(out, ref_bf16, atol=1e-3, rtol=1e-3)

    # Full-f32 reference (same math as the PyTorch module); loose tolerance
    # accounts for the intentional bf16 MXU inputs.
    ref = jnp.tanh(x @ w1 + b1)
    ref = jnp.tanh(ref @ w2 + b2)
    ref = ref @ w3 + b3
    assert jnp.allclose(out, ref, atol=5e-2, rtol=5e-2)

    print("KERNEL_OK")
</pallas_src>

<mosaic_0001>
module attributes {stable_mosaic.version = 11 : i64} {
  func.func @mlp_kernel(%arg0: i32, %arg1: memref<8x32xf32, #tpu.memory_space<vmem>>, %arg2: memref<32x128xbf16, #tpu.memory_space<vmem>>, %arg3: memref<1x128xf32, #tpu.memory_space<vmem>>, %arg4: memref<128x128xbf16, #tpu.memory_space<vmem>>, %arg5: memref<1x128xf32, #tpu.memory_space<vmem>>, %arg6: memref<128x16xbf16, #tpu.memory_space<vmem>>, %arg7: memref<1x16xf32, #tpu.memory_space<vmem>>, %arg8: memref<8x16xf32, #tpu.memory_space<vmem>>) attributes {dimension_semantics = [#tpu.dimension_semantics<parallel>], iteration_bounds = array<i64: 1>, scalar_prefetch = 0 : i64, scratch_operands = 0 : i64, tpu.core_type = #tpu.core_type<tc>, window_params = [{transform_indices = @transform_0, window_bounds = array<i64: 8, 32>}, {pipeline_mode = #tpu.pipeline_mode<synchronous>, transform_indices = @transform_1, window_bounds = array<i64: 32, 128>}, {pipeline_mode = #tpu.pipeline_mode<synchronous>, transform_indices = @transform_2, window_bounds = array<i64: 1, 128>}, {pipeline_mode = #tpu.pipeline_mode<synchronous>, transform_indices = @transform_3, window_bounds = array<i64: 128, 128>}, {pipeline_mode = #tpu.pipeline_mode<synchronous>, transform_indices = @transform_4, window_bounds = array<i64: 1, 128>}, {pipeline_mode = #tpu.pipeline_mode<synchronous>, transform_indices = @transform_5, window_bounds = array<i64: 128, 16>}, {pipeline_mode = #tpu.pipeline_mode<synchronous>, transform_indices = @transform_6, window_bounds = array<i64: 1, 16>}, {transform_indices = @transform_7, window_bounds = array<i64: 8, 16>}]} {
    %c0 = arith.constant 0 : index
    %c0_0 = arith.constant 0 : index
    %0 = vector.load %arg1[%c0, %c0_0] : memref<8x32xf32, #tpu.memory_space<vmem>>, vector<8x32xf32>
    %1 = arith.truncf %0 : vector<8x32xf32> to vector<8x32xbf16>
    %c0_1 = arith.constant 0 : index
    %c0_2 = arith.constant 0 : index
    %2 = vector.load %arg2[%c0_1, %c0_2] : memref<32x128xbf16, #tpu.memory_space<vmem>>, vector<32x128xbf16>
    %cst = arith.constant dense<0.000000e+00> : vector<8x128xf32>
    %3 = tpu.matmul %1, %2, %cst {dimension_numbers = #tpu.dot_dimension_numbers<[1], [0], [0], [1], [0, 0, 1, 1], [], []>} : vector<8x32xbf16>, vector<32x128xbf16>, vector<8x128xf32> -> vector<8x128xf32>
    %c0_3 = arith.constant 0 : index
    %c0_4 = arith.constant 0 : index
    %4 = vector.load %arg3[%c0_3, %c0_4] : memref<1x128xf32, #tpu.memory_space<vmem>>, vector<1x128xf32>
    %5 = vector.broadcast %4 : vector<1x128xf32> to vector<8x128xf32>
    %6 = arith.addf %3, %5 : vector<8x128xf32>
    %7 = math.tanh %6 : vector<8x128xf32>
    %8 = arith.truncf %7 : vector<8x128xf32> to vector<8x128xbf16>
    %c0_5 = arith.constant 0 : index
    %c0_6 = arith.constant 0 : index
    %9 = vector.load %arg4[%c0_5, %c0_6] : memref<128x128xbf16, #tpu.memory_space<vmem>>, vector<128x128xbf16>
    %cst_7 = arith.constant dense<0.000000e+00> : vector<8x128xf32>
    %10 = tpu.matmul %8, %9, %cst_7 {dimension_numbers = #tpu.dot_dimension_numbers<[1], [0], [0], [1], [0, 0, 1, 1], [], []>} : vector<8x128xbf16>, vector<128x128xbf16>, vector<8x128xf32> -> vector<8x128xf32>
    %c0_8 = arith.constant 0 : index
    %c0_9 = arith.constant 0 : index
    %11 = vector.load %arg5[%c0_8, %c0_9] : memref<1x128xf32, #tpu.memory_space<vmem>>, vector<1x128xf32>
    %12 = vector.broadcast %11 : vector<1x128xf32> to vector<8x128xf32>
    %13 = arith.addf %10, %12 : vector<8x128xf32>
    %14 = math.tanh %13 : vector<8x128xf32>
    %15 = arith.truncf %14 : vector<8x128xf32> to vector<8x128xbf16>
    %c0_10 = arith.constant 0 : index
    %c0_11 = arith.constant 0 : index
    %16 = vector.load %arg6[%c0_10, %c0_11] : memref<128x16xbf16, #tpu.memory_space<vmem>>, vector<128x16xbf16>
    %cst_12 = arith.constant dense<0.000000e+00> : vector<8x16xf32>
    %17 = tpu.matmul %15, %16, %cst_12 {dimension_numbers = #tpu.dot_dimension_numbers<[1], [0], [0], [1], [0, 0, 1, 1], [], []>} : vector<8x128xbf16>, vector<128x16xbf16>, vector<8x16xf32> -> vector<8x16xf32>
    %c0_13 = arith.constant 0 : index
    %c0_14 = arith.constant 0 : index
    %18 = vector.load %arg7[%c0_13, %c0_14] : memref<1x16xf32, #tpu.memory_space<vmem>>, vector<1x16xf32>
    %19 = vector.broadcast %18 : vector<1x16xf32> to vector<8x16xf32>
    %20 = arith.addf %17, %19 : vector<8x16xf32>
    %c0_15 = arith.constant 0 : index
    %c0_16 = arith.constant 0 : index
    %21 = vector.load %arg8[%c0_15, %c0_16] : memref<8x16xf32, #tpu.memory_space<vmem>>, vector<8x16xf32>
    tpu.vector_store %arg8[%c0_15, %c0_16], %20 {strides = array<i32>} : memref<8x16xf32, #tpu.memory_space<vmem>>, vector<8x16xf32>,
    return
  }
  func.func @transform_0(%arg0: i32) -> (i32, i32) {
    %c0_i32 = arith.constant 0 : i32
    %c0_i32_0 = arith.constant 0 : i32
    return %arg0, %c0_i32 : i32, i32
  }
  func.func @transform_1(%arg0: i32) -> (i32, i32) {
    %c0_i32 = arith.constant 0 : i32
    %c0_i32_0 = arith.constant 0 : i32
    %c0_i32_1 = arith.constant 0 : i32
    return %c0_i32, %c0_i32_0 : i32, i32
  }
  func.func @transform_2(%arg0: i32) -> (i32, i32) {
    %c0_i32 = arith.constant 0 : i32
    %c0_i32_0 = arith.constant 0 : i32
    %c0_i32_1 = arith.constant 0 : i32
    return %c0_i32, %c0_i32_0 : i32, i32
  }
  func.func @transform_3(%arg0: i32) -> (i32, i32) {
    %c0_i32 = arith.constant 0 : i32
    %c0_i32_0 = arith.constant 0 : i32
    %c0_i32_1 = arith.constant 0 : i32
    return %c0_i32, %c0_i32_0 : i32, i32
  }
  func.func @transform_4(%arg0: i32) -> (i32, i32) {
    %c0_i32 = arith.constant 0 : i32
    %c0_i32_0 = arith.constant 0 : i32
    %c0_i32_1 = arith.constant 0 : i32
    return %c0_i32, %c0_i32_0 : i32, i32
  }
  func.func @transform_5(%arg0: i32) -> (i32, i32) {
    %c0_i32 = arith.constant 0 : i32
    %c0_i32_0 = arith.constant 0 : i32
    %c0_i32_1 = arith.constant 0 : i32
    return %c0_i32, %c0_i32_0 : i32, i32
  }
  func.func @transform_6(%arg0: i32) -> (i32, i32) {
    %c0_i32 = arith.constant 0 : i32
    %c0_i32_0 = arith.constant 0 : i32
    %c0_i32_1 = arith.constant 0 : i32
    return %c0_i32, %c0_i32_0 : i32, i32
  }
  func.func @transform_7(%arg0: i32) -> (i32, i32) {
    %c0_i32 = arith.constant 0 : i32
    %c0_i32_0 = arith.constant 0 : i32
    return %arg0, %c0_i32 : i32, i32
  }
}

</mosaic_0001>

<bundles_post_ra>
// kernel: tpu_custom_call.1
= control target key start
LH: loop header
LB: loop body
LE: loop exit
PB: predicated region body
PF: predicated region fallthrough
CT: control target
= control target key end

     0   :  { %12 = vsyncpa [#allocation3], 0  ;;  %s672_s0 = inlined_call_operand.hbm [shape: f32[8,32], index: 0, kind: input, shape index: {}]   ;;  %s673_s1 = inlined_call_operand.vmem [shape: bf16[32,128], index: 1, kind: input, shape index: {}]   ;;  %s674_s2 = inlined_call_operand.vmem [shape: f32[1,128], index: 2, kind: input, shape index: {}]   ;;  %s675_s3 = inlined_call_operand.vmem [shape: bf16[128,128], index: 3, kind: input, shape index: {}]   ;;  %s676_s4 = inlined_call_operand.vmem [shape: f32[1,128], index: 4, kind: input, shape index: {}]   ;;  %s677_s5 = inlined_call_operand.vmem [shape: bf16[128,16], index: 5, kind: input, shape index: {}]   ;;  %s678_s6 = inlined_call_operand.vmem [shape: f32[1,16], index: 6, kind: input, shape index: {}]   ;;  %s679_s7 = inlined_call_operand.hbm [shape: f32[8,16], index: 7, kind: output, shape index: {}]  }
   0x1   :  { %13 = vsyncpa [#allocation4], 0  ;;  %s517_s24 = smov [#allocation2]   ;;  %s469_s28 = scalar_lea.hbm %s672_s0, 128 }
   0x2   :  { %s20_s25 = sshll.u32 %s517_s24, 4  ;;  %p470_p0 = scmp.ne.s32.totalorder %s672_s0, %s469_s28  ;;  %s21_s25 = int_to_ptr.vmem [resolvable:$true] %s20_s25 }
   0x3   :  { %p473_p1 = scmp.lt.u32.totalorder %s469_s28, %s672_s0 }
   0x5   :  { %p475_p2 = pnand %p473_p1, %p470_p0 }
   0x7   :  { %478 = shalt.err (!%p475_p2)
}
   0x8   :  { %s479_s10 = scalar_lea.vmem %s21_s25, 128  ;;  %p484_p4 = scmp.lt.s32.totalorder %s21_s25, %s21_s25 }
   0x9   :  { %p480_p3 = scmp.ne.s32.totalorder %s21_s25, %s479_s10  ;;  %p485_p5 = scmp.lt.s32.totalorder %s479_s10, %s479_s10 }
   0xb   :  { %p486_p6 = por %p485_p5, %p484_p4 }
   0xd   :  { %p487_p7 = pnand %p486_p6, %p480_p3 }
   0xf   :  { %490 = shalt.err (!%p487_p7)
}
  0x10   :  { %23 = dma.hbm_to_vmem [thread:$0]  %s672_s0, 128, %s21_s25, [#allocation3]  }
  0x11   :  { %513 = dma.done.wait [#allocation3], 128  }
  0x12   :  { %514 = vsyncadd [#allocation3], 4294967168  ;;  %v518_v0 = vmov 0.0   ;;  %vm519_vm0 = vmmov 0   ;;  %v447_v1 = vld [vmem:[%s673_s1] sm:$0xff]   ;;  %v448_v2 = vld [vmem:[%s673_s1 + $0x8] sm:$0xff]  }
  0x13   :  { %395 = vmatprep.subr.bf16.mxu0 %v518_v0  ;;  %399 = vmatprep.mubr.msk.bf16.mxu0 %vm519_vm0, %v518_v0  ;;  %v40_v3 = vld [vmem:[#allocation2] sm:$0xff]  ;;  %v450_v6 = vld [vmem:[%s675_s3 + $0x8] sm:$0xff]   ;;  %vm65_vm1 = vcmask 261120   ;;  %v451_v7 = vld [vmem:[%s675_s3 + $0x10] sm:$0xff]   ;;  %s520_s26 = smov [#allocation5]   ;;  %vm335_vm2 = vcmask 130048  }
  0x14   :  { %403 = vmatprep.subr.bf16.mxu1 %v518_v0  ;;  %419 = vmatprep.mubr.msk.bf16.mxu1 %vm519_vm0, %v518_v0  ;;  %v449_v4 = vld [vmem:[%s675_s3] sm:$0xff]   ;;  %v41_v5 = vpack.c.bf16 %v40_v3, %v40_v3  ;;  %v452_v8 = vld [vmem:[%s675_s3 + $0x18] sm:$0xff]   ;;  %v454_v10 = vld [vmem:[%s675_s3 + $0x28] sm:$0xff]  }
  0x15   :  { %396 = vmatpush3.bf16.msra.mxu0 %v447_v1  ;;  %404 = vmatpush3.bf16.msra.mxu1 %v449_v4  ;;  %v453_v9 = vld [vmem:[%s675_s3 + $0x20] sm:$0xff]   ;;  %v455_v11 = vld [vmem:[%s675_s3 + $0x30] sm:$0xff]   ;;  %v456_v12 = vld [vmem:[%s675_s3 + $0x38] sm:$0xff]  }
  0x16   :  { %397 = vmatprep.subr.bf16.mxu0 %v518_v0  ;;  %405 = vmatprep.subr.bf16.mxu1 %v518_v0  ;;  %v457_v13 = vld [vmem:[%s677_s5] sm:$0xff]   ;;  %v458_v14 = vld [vmem:[%s677_s5 + $0x8] sm:$0xff]   ;;  %v459_v15 = vld [vmem:[%s677_s5 + $0x10] sm:$0xff]  }
  0x17   :  { %v460_v16 = vld [vmem:[%s677_s5 + $0x18] sm:$0xff]   ;;  %v352_v17 = vld [vmem:[%s674_s2] ss:$0 sm:$0xff]  ;;  %v462_v26 = vld [vmem:[%s677_s5 + $0x28] sm:$0xff]  }
  0x18   :  { %v461_v25 = vld [vmem:[%s677_s5 + $0x20] sm:$0xff]   ;;  %v463_v27 = vld [vmem:[%s677_s5 + $0x30] sm:$0xff]   ;;  %v464_v28 = vld [vmem:[%s677_s5 + $0x38] sm:$0xff]   ;;  %s343_s5 = sshll.u32 %s520_s26, 4  ;;  %s344_s5 = int_to_ptr.vmem [resolvable:$true] %s343_s5 }
  0x19   :  { %398 = vmatpush3.bf16.msra.mxu0 %v448_v2  ;;  %406 = vmatpush3.bf16.msra.mxu1 %v450_v6  ;;  %v356_v29 = vld [vmem:[%s676_s4] ss:$0 sm:$0xff]  ;;  %s491_s4 = scalar_lea.vmem %s344_s5, 128  ;;  %p496_p9 = scmp.lt.s32.totalorder %s344_s5, %s344_s5 }
  0x1a   :  { %423 = vmatprep.subr.bf16.mxu0 %v518_v0  ;;  %407 = vmatprep.subr.bf16.mxu1 %v518_v0  ;;  %v365_v37 = vld [vmem:[%s678_s6] ss:$0 sm:$0xff]  ;;  %p492_p8 = scmp.ne.s32.totalorder %s344_s5, %s491_s4  ;;  %p497_p10 = scmp.lt.s32.totalorder %s491_s4, %s491_s4 }
  0x1c   :  { %400 = vmatmul.mubr.msk.bf16.vlgmr.msra.gmra.mrb[0].mxu0 %vm65_vm1, %v41_v5  ;;  %p498_p11 = por %p497_p10, %p496_p9 }
  0x1d   :  { %439 = vmatprep.mubr.msk.bf16.mxu0 %vm519_vm0, %v518_v0  ;;  %408 = vmatpush3.bf16.msra.mxu1 %v451_v7 }
  0x1e   :  { %409 = vmatprep.subr.bf16.mxu1 %v518_v0  ;;  %424 = vmatpush3.bf16.msra.mxu0 %v457_v13  ;;  %p499_p12 = pnand %p498_p11, %p492_p8 }
  0x1f   :  { %425 = vmatprep.subr.bf16.mxu0 %v518_v0 }
  0x21   :  { %410 = vmatpush3.bf16.msra.mxu1 %v452_v8 }
  0x22   :  { %411 = vmatprep.subr.bf16.mxu1 %v518_v0  ;;  %426 = vmatpush3.bf16.msra.mxu0 %v458_v14 }
  0x23   :  { %427 = vmatprep.subr.bf16.mxu0 %v518_v0 }
  0x25   :  { %412 = vmatpush3.bf16.msra.mxu1 %v453_v9 }
  0x26   :  { %413 = vmatprep.subr.bf16.mxu1 %v518_v0  ;;  %428 = vmatpush3.bf16.msra.mxu0 %v459_v15 }
  0x27   :  { %429 = vmatprep.subr.bf16.mxu0 %v518_v0 }
  0x29   :  { %414 = vmatpush3.bf16.msra.mxu1 %v454_v10 }
  0x2a   :  { %415 = vmatprep.subr.bf16.mxu1 %v518_v0  ;;  %430 = vmatpush3.bf16.msra.mxu0 %v460_v16 }
  0x2b   :  { %431 = vmatprep.subr.bf16.mxu0 %v518_v0 }
  0x2d   :  { %416 = vmatpush3.bf16.msra.mxu1 %v455_v11 }
  0x2e   :  { %417 = vmatprep.subr.bf16.mxu1 %v518_v0  ;;  %432 = vmatpush3.bf16.msra.mxu0 %v461_v25 }
  0x2f   :  { %433 = vmatprep.subr.bf16.mxu0 %v518_v0 }
  0x31   :  { %418 = vmatpush3.bf16.msra.mxu1 %v456_v12 }
  0x32   :  { %434 = vmatpush3.bf16.msra.mxu0 %v462_v26 }
  0x33   :  { %435 = vmatprep.subr.bf16.mxu0 %v518_v0 }
  0x36   :  { %436 = vmatpush3.bf16.msra.mxu0 %v463_v27 }
  0x37   :  { %437 = vmatprep.subr.bf16.mxu0 %v518_v0 }
  0x3a   :  { %438 = vmatpush3.bf16.msra.mxu0 %v464_v28 }
  0xef   :  { %v103_v18 = vpop.f32.mrb[0].mxu0 }
  0xf0   :  { %v104_v19 = vadd.f32 %v352_v17, %v103_v18  ;;  %v401_v20 = vpop.f32.mrb[1].mxu0 }
  0xf1   :  { %v106_v21 = vpop.f32.mrb[2].mxu0 }
  0xf2   :  { %465 = vtanh.f32 %v104_v19  ;;  %v402_v22 = vpop.f32.mrb[3].mxu0 }
  0xfc   :  { %v466_v23 = vpop.eup %465 }
  0xfd   :  { %v110_v24 = vpack.c.bf16 %v466_v23, %v466_v23 }
  0xff   :  { %420 = vmatmul.mubr.bf16.vlgmr.msra.gmra.mrb[0].mxu1 %v110_v24 }
 0x1d2   :  { %v216_v30 = vpop.f32.mrb[0].mxu1 }
 0x1d3   :  { %v217_v31 = vadd.f32 %v356_v29, %v216_v30  ;;  %v421_v32 = vpop.f32.mrb[1].mxu1 }
 0x1d4   :  { %v219_v33 = vpop.f32.mrb[2].mxu1 }
 0x1d5   :  { %467 = vtanh.f32 %v217_v31  ;;  %v422_v34 = vpop.f32.mrb[3].mxu1 }
 0x1df   :  { %v468_v35 = vpop.eup %467 }
 0x1e0   :  { %v223_v36 = vpack.c.bf16 %v468_v35, %v468_v35 }
 0x1e2   :  { %440 = vmatmul.mubr.bf16.vlgmr.msra.gmra.mrb[4].mxu0 %v223_v36 }
 0x2b5   :  { %v329_v38 = vpop.f32.mrb[4].mxu0 }
 0x2b6   :  { %v330_v39 = vadd.f32 %v365_v37, %v329_v38  ;;  %v441_v40 = vpop.f32.mrb[5].mxu0 }
 0x2b7   :  { %v332_v41 = vpop.f32.mrb[6].mxu0 }
 0x2b8   :  { %v442_v42 = vpop.f32.mrb[7].mxu0  ;;  %336 = vst.msk [vmem:[#allocation5] sm:$0xff] %vm335_vm2, %v330_v39 }
 0x2b9   :  { %502 = shalt.err (!%p499_p12)
}
 0x2ba   :  { %s503_s6 = scalar_lea.hbm %s679_s7, 128 }
 0x2bb   :  { %p504_p13 = scmp.ne.s32.totalorder %s679_s7, %s503_s6  ;;  %p507_p0 = scmp.lt.u32.totalorder %s503_s6, %s679_s7 }
 0x2bd   :  { %p509_p1 = pnand %p507_p0, %p504_p13 }
 0x2bf   :  { %512 = shalt.err (!%p509_p1)
}
 0x2c0   :  { %346 = dma.vmem_to_hbm [thread:$0]  %s344_s5, 128, %s679_s7, [#allocation4]  }
 0x2c1   :  { %515 = dma.done.wait [#allocation4], 128  }
 0x2c2   :  { %516 = vsyncadd [#allocation4], 4294967168 }
 0x2c3   :  { %350 = vsyncpa [#allocation3], 1 }
 0x2c4   :  { %351 = vsyncpa [#allocation4], 1 }

</bundles_post_ra>
